<compile_context>
chip_gen: v7x
topology: tpu7x:2x2x1
jax: 0.10.0
libtpu: 0.0.40
codegen_flags: <defaults>
</compile_context>

<pallas_src>
import functools

import jax
import jax.numpy as jnp
from jax.experimental import pallas as pl
from jax.experimental.pallas import tpu as pltpu


def _round_up(x, m):
    return ((x + m - 1) // m) * m


def _decoder_rnn_kernel(x_ref, h_ref, w_i_ref, w_h_ref, b_gru_ref,
                        w_out_ref, b_out_ref, out_ref, h_out_ref, *, hidden_size):
    """Single-step GRU cell + Linear + Softmax(dim=1), all in one VMEM tile.

    Gate pre-activations are computed with two fused lane-dense matmuls whose
    output columns are laid out [r | z | n | pad] (width padded to 128*k).
    """
    H = hidden_size
    x = x_ref[...]            # (B, O)
    h = h_ref[...]            # (B, H)

    dot = functools.partial(jnp.dot, preferred_element_type=jnp.float32)

    # Fused GRU gate matmuls (PyTorch nn.GRU semantics), biases folded per side.
    gi = dot(x, w_i_ref[...]) + b_gru_ref[0:1, :]   # (B, 3H_pad)
    gh = dot(h, w_h_ref[...]) + b_gru_ref[1:2, :]   # (B, 3H_pad)

    rz = jax.nn.sigmoid(gi[:, 0:2 * H] + gh[:, 0:2 * H])
    r = rz[:, 0:H]
    z = rz[:, H:2 * H]
    n = jnp.tanh(gi[:, 2 * H:3 * H] + r * gh[:, 2 * H:3 * H])
    h_new = n + z * (h - n)                          # == (1-z)*n + z*h

    # Linear(hidden_size -> output_size) + Softmax over features (dim=1).
    # Output is lane-dense (padded columns carry a -1e30 bias -> prob exactly 0).
    logits = dot(h_new, w_out_ref[...]) + b_out_ref[...]     # (B, O_pad)
    m = jnp.max(logits, axis=1, keepdims=True)
    e = jnp.exp(logits - m)
    denom = jnp.sum(e, axis=1, keepdims=True)
    probs = e * pl.reciprocal(denom, approx=True)

    out_ref[...] = probs.astype(out_ref.dtype)
    h_out_ref[...] = h_new.astype(h_out_ref.dtype)


def init_decoder_params(key, hidden_size, output_size):
    """Deterministic parameter init matching nn.GRU / nn.Linear shapes."""
    H, O = hidden_size, output_size
    ks = jax.random.split(key, 6)
    bound = 1.0 / jnp.sqrt(H)
    u = lambda k, shape, b: jax.random.uniform(k, shape, jnp.float32, -b, b)
    return {
        "w_ih": u(ks[0], (3 * H, O), bound),   # GRU weight_ih_l0 (gates r|z|n)
        "w_hh": u(ks[1], (3 * H, H), bound),   # GRU weight_hh_l0
        "b_ih": u(ks[2], (3 * H,), bound),     # GRU bias_ih_l0
        "b_hh": u(ks[3], (3 * H,), bound),     # GRU bias_hh_l0
        "w_out": u(ks[4], (O, H), bound),      # Linear weight
        "b_out": u(ks[5], (O,), bound),        # Linear bias
    }


def prepare_decoder_params(params):
    """One-time packing: transpose, fuse gates, fold biases, pad to 128 lanes.

    Run once outside the decode loop; the per-step forward never re-slices or
    re-transposes weights.
    """
    H = params["w_hh"].shape[1]
    O = params["w_ih"].shape[1]
    G3 = 3 * H
    G3p = _round_up(G3, 128)        # fused gate width, lane-dense
    Op = _round_up(O, 128)          # padded Linear output width, lane-dense

    w_i = jnp.zeros((O, G3p), jnp.float32).at[:, :G3].set(params["w_ih"].T)
    w_h = jnp.zeros((H, G3p), jnp.float32).at[:, :G3].set(params["w_hh"].T)

    b_gru = jnp.zeros((2, G3p), jnp.float32)
    b_gru = b_gru.at[0, :G3].set(params["b_ih"])
    b_gru = b_gru.at[1, :G3].set(params["b_hh"])

    w_out = jnp.zeros((H, Op), jnp.float32).at[:, :O].set(params["w_out"].T)
    # Padded output columns get a huge negative bias so softmax gives them 0.
    b_out = jnp.full((1, Op), -1e30, jnp.float32).at[0, :O].set(params["b_out"])

    return {"w_i": w_i, "w_h": w_h, "b_gru": b_gru,
            "w_out": w_out, "b_out": b_out,
            "hidden_size": H, "output_size": O}


def decoder_rnn_forward(x, hidden, packed):
    """x: reshapable to (B, output_size); hidden: (1, B, hidden_size).

    Returns (softmax_output (B, O), new_hidden (1, B, H)) like the PyTorch module.
    """
    H = packed["hidden_size"]
    O = packed["output_size"]
    B = hidden.shape[1]
    G3p = packed["w_i"].shape[1]
    Op = packed["w_out"].shape[1]

    x2 = x.reshape(B, O).astype(jnp.float32)          # input.view(1, B, -1)[0]
    h2 = hidden.reshape(B, H).astype(jnp.float32)

    inputs = (x2, h2, packed["w_i"], packed["w_h"], packed["b_gru"],
              packed["w_out"], packed["b_out"])

    bytes_accessed = (sum(int(a.size) * a.dtype.itemsize for a in inputs)
                      + B * (Op + H) * 4)
    cost = pl.CostEstimate(
        flops=2 * B * (O + H) * G3p + 2 * B * H * Op,
        transcendentals=B * (3 * H + Op),
        bytes_accessed=bytes_accessed,
    )

    vmem_spec = pl.BlockSpec(memory_space=pltpu.MemorySpace.VMEM)
    out_pad, h_new = pl.pallas_call(
        functools.partial(_decoder_rnn_kernel, hidden_size=H),
        out_shape=(jax.ShapeDtypeStruct((B, Op), jnp.float32),
                   jax.ShapeDtypeStruct((B, H), jnp.float32)),
        in_specs=[vmem_spec] * len(inputs),
        out_specs=(vmem_spec, vmem_spec),
        cost_estimate=cost,
    )(*inputs)

    return out_pad[:, :O], h_new.reshape(1, B, H)


def _reference_forward(x, hidden, params):
    """Pure-JAX reference reproducing PyTorch GRU + Linear + Softmax."""
    H = params["w_hh"].shape[1]
    O = params["w_ih"].shape[1]
    B = hidden.shape[1]
    x2 = x.reshape(B, O)
    h = hidden.reshape(B, H)
    gi = x2 @ params["w_ih"].T + params["b_ih"]
    gh = h @ params["w_hh"].T + params["b_hh"]
    i_r, i_z, i_n = gi[:, :H], gi[:, H:2 * H], gi[:, 2 * H:]
    h_r, h_z, h_n = gh[:, :H], gh[:, H:2 * H], gh[:, 2 * H:]
    r = jax.nn.sigmoid(i_r + h_r)
    z = jax.nn.sigmoid(i_z + h_z)
    n = jnp.tanh(i_n + r * h_n)
    h_new = (1.0 - z) * n + z * h
    logits = h_new @ params["w_out"].T + params["b_out"]
    return jax.nn.softmax(logits, axis=1), h_new.reshape(1, B, H)


if __name__ == "__main__":
    batch = 8
    hidden_size = 32
    output_size = 16

    key = jax.random.PRNGKey(0)
    k_par, k_x, k_h = jax.random.split(key, 3)

    params = init_decoder_params(k_par, hidden_size, output_size)
    packed = prepare_decoder_params(params)     # one-time weight packing

    # "input" can be any tensor with batch*output_size elements (it is .view'd);
    # use (batch, output_size) directly.
    x = jax.random.normal(k_x, (batch, output_size), jnp.float32)
    hidden = jax.random.normal(k_h, (1, batch, hidden_size), jnp.float32)

    out, h_new = decoder_rnn_forward(x, hidden, packed)
    out = jax.block_until_ready(out)
    h_new = jax.block_until_ready(h_new)

    ref_out, ref_h = _reference_forward(x, hidden, params)
    assert out.shape == (batch, output_size) and h_new.shape == (1, batch, hidden_size)
    # out goes through pl.reciprocal(approx=True) -> slightly looser tolerance.
    assert jnp.allclose(out, ref_out, atol=1e-3, rtol=1e-3)
    assert jnp.allclose(h_new, ref_h, atol=1e-5, rtol=1e-5)

    print("KERNEL_OK")
</pallas_src>

<mosaic_0001>
module attributes {stable_mosaic.version = 11 : i64} {
  func.func @_decoder_rnn_kernel(%arg0: memref<8x16xf32, #tpu.memory_space<vmem>>, %arg1: memref<8x32xf32, #tpu.memory_space<vmem>>, %arg2: memref<16x128xf32, #tpu.memory_space<vmem>>, %arg3: memref<32x128xf32, #tpu.memory_space<vmem>>, %arg4: memref<2x128xf32, #tpu.memory_space<vmem>>, %arg5: memref<32x128xf32, #tpu.memory_space<vmem>>, %arg6: memref<1x128xf32, #tpu.memory_space<vmem>>, %arg7: memref<8x128xf32, #tpu.memory_space<vmem>>, %arg8: memref<8x32xf32, #tpu.memory_space<vmem>>) attributes {dimension_semantics = [], scalar_prefetch = 0 : i64, scratch_operands = 0 : i64, tpu.core_type = #tpu.core_type<tc>} {
    %c0 = arith.constant 0 : index
    %c0_0 = arith.constant 0 : index
    %0 = vector.load %arg0[%c0, %c0_0] : memref<8x16xf32, #tpu.memory_space<vmem>>, vector<8x16xf32>
    %c0_1 = arith.constant 0 : index
    %c0_2 = arith.constant 0 : index
    %1 = vector.load %arg1[%c0_1, %c0_2] : memref<8x32xf32, #tpu.memory_space<vmem>>, vector<8x32xf32>
    %c0_3 = arith.constant 0 : index
    %c0_4 = arith.constant 0 : index
    %2 = vector.load %arg2[%c0_3, %c0_4] : memref<16x128xf32, #tpu.memory_space<vmem>>, vector<16x128xf32>
    %cst = arith.constant dense<0.000000e+00> : vector<8x128xf32>
    %3 = tpu.matmul %0, %2, %cst {dimension_numbers = #tpu.dot_dimension_numbers<[1], [0], [0], [1], [0, 0, 1, 1], [], []>} : vector<8x16xf32>, vector<16x128xf32>, vector<8x128xf32> -> vector<8x128xf32>
    %c0_5 = arith.constant 0 : index
    %c0_6 = arith.constant 0 : index
    %4 = vector.load %arg4[%c0_5, %c0_6] : memref<2x128xf32, #tpu.memory_space<vmem>>, vector<1x128xf32>
    %5 = vector.broadcast %4 : vector<1x128xf32> to vector<8x128xf32>
    %6 = arith.addf %3, %5 : vector<8x128xf32>
    %c0_7 = arith.constant 0 : index
    %c0_8 = arith.constant 0 : index
    %7 = vector.load %arg3[%c0_7, %c0_8] : memref<32x128xf32, #tpu.memory_space<vmem>>, vector<32x128xf32>
    %cst_9 = arith.constant dense<0.000000e+00> : vector<8x128xf32>
    %8 = tpu.matmul %1, %7, %cst_9 {dimension_numbers = #tpu.dot_dimension_numbers<[1], [0], [0], [1], [0, 0, 1, 1], [], []>} : vector<8x32xf32>, vector<32x128xf32>, vector<8x128xf32> -> vector<8x128xf32>
    %c1 = arith.constant 1 : index
    %c0_10 = arith.constant 0 : index
    %9 = vector.load %arg4[%c1, %c0_10] : memref<2x128xf32, #tpu.memory_space<vmem>>, vector<1x128xf32>
    %10 = vector.broadcast %9 : vector<1x128xf32> to vector<8x128xf32>
    %11 = arith.addf %8, %10 : vector<8x128xf32>
    %12 = vector.extract_strided_slice %6 {offsets = [0, 0], sizes = [8, 64], strides = [1, 1]} : vector<8x128xf32> to vector<8x64xf32>
    %13 = vector.extract_strided_slice %11 {offsets = [0, 0], sizes = [8, 64], strides = [1, 1]} : vector<8x128xf32> to vector<8x64xf32>
    %14 = arith.addf %12, %13 : vector<8x64xf32>
    %15 = arith.negf %14 : vector<8x64xf32>
    %16 = math.exp %15 : vector<8x64xf32>
    %cst_11 = arith.constant 1.000000e+00 : f32
    %17 = vector.broadcast %cst_11 : f32 to vector<8x64xf32>
    %18 = arith.addf %17, %16 : vector<8x64xf32>
    %19 = arith.divf %17, %18 : vector<8x64xf32>
    %20 = vector.extract_strided_slice %19 {offsets = [0, 0], sizes = [8, 32], strides = [1, 1]} : vector<8x64xf32> to vector<8x32xf32>
    %21 = vector.extract_strided_slice %19 {offsets = [0, 32], sizes = [8, 32], strides = [1, 1]} : vector<8x64xf32> to vector<8x32xf32>
    %22 = vector.extract_strided_slice %6 {offsets = [0, 64], sizes = [8, 32], strides = [1, 1]} : vector<8x128xf32> to vector<8x32xf32>
    %23 = vector.extract_strided_slice %11 {offsets = [0, 64], sizes = [8, 32], strides = [1, 1]} : vector<8x128xf32> to vector<8x32xf32>
    %24 = arith.mulf %20, %23 : vector<8x32xf32>
    %25 = arith.addf %22, %24 : vector<8x32xf32>
    %26 = math.tanh %25 : vector<8x32xf32>
    %27 = arith.subf %1, %26 : vector<8x32xf32>
    %28 = arith.mulf %21, %27 : vector<8x32xf32>
    %29 = arith.addf %26, %28 : vector<8x32xf32>
    %c0_12 = arith.constant 0 : index
    %c0_13 = arith.constant 0 : index
    %30 = vector.load %arg5[%c0_12, %c0_13] : memref<32x128xf32, #tpu.memory_space<vmem>>, vector<32x128xf32>
    %cst_14 = arith.constant dense<0.000000e+00> : vector<8x128xf32>
    %31 = tpu.matmul %29, %30, %cst_14 {dimension_numbers = #tpu.dot_dimension_numbers<[1], [0], [0], [1], [0, 0, 1, 1], [], []>} : vector<8x32xf32>, vector<32x128xf32>, vector<8x128xf32> -> vector<8x128xf32>
    %c0_15 = arith.constant 0 : index
    %c0_16 = arith.constant 0 : index
    %32 = vector.load %arg6[%c0_15, %c0_16] : memref<1x128xf32, #tpu.memory_space<vmem>>, vector<1x128xf32>
    %33 = vector.broadcast %32 : vector<1x128xf32> to vector<8x128xf32>
    %34 = arith.addf %31, %33 : vector<8x128xf32>
    %cst_17 = arith.constant dense<0xFF800000> : vector<8xf32>
    %35 = vector.multi_reduction <maximumf>, %34, %cst_17 [1] : vector<8x128xf32> to vector<8xf32>
    %36 = vector.shape_cast %35 : vector<8xf32> to vector<8x1xf32>
    %37 = vector.broadcast %36 : vector<8x1xf32> to vector<8x128xf32>
    %38 = arith.subf %34, %37 : vector<8x128xf32>
    %39 = math.exp %38 : vector<8x128xf32>
    %cst_18 = arith.constant dense<0.000000e+00> : vector<8xf32>
    %40 = vector.multi_reduction <add>, %39, %cst_18 [1] : vector<8x128xf32> to vector<8xf32>
    %41 = vector.shape_cast %40 : vector<8xf32> to vector<8x1xf32>
    %42 = tpu.reciprocal %41 {approx = true} : vector<8x1xf32> -> vector<8x1xf32>
    %43 = vector.broadcast %42 : vector<8x1xf32> to vector<8x128xf32>
    %44 = arith.mulf %39, %43 : vector<8x128xf32>
    %c0_19 = arith.constant 0 : index
    %c0_20 = arith.constant 0 : index
    %45 = vector.load %arg7[%c0_19, %c0_20] : memref<8x128xf32, #tpu.memory_space<vmem>>, vector<8x128xf32>
    tpu.vector_store %arg7[%c0_19, %c0_20], %44 {strides = array<i32>} : memref<8x128xf32, #tpu.memory_space<vmem>>, vector<8x128xf32>,
    %c0_21 = arith.constant 0 : index
    %c0_22 = arith.constant 0 : index
    %46 = vector.load %arg8[%c0_21, %c0_22] : memref<8x32xf32, #tpu.memory_space<vmem>>, vector<8x32xf32>
    tpu.vector_store %arg8[%c0_21, %c0_22], %29 {strides = array<i32>} : memref<8x32xf32, #tpu.memory_space<vmem>>, vector<8x32xf32>,
    return
  }
}

</mosaic_0001>

<bundles_post_ra>
// kernel: tpu_custom_call.1
= control target key start
LH: loop header
LB: loop body
LE: loop exit
PB: predicated region body
PF: predicated region fallthrough
CT: control target
= control target key end

     0   :  { %14 = vsyncpa [#allocation3], 0  ;;  %s850_s0 = inlined_call_operand.hbm [shape: f32[8,16], index: 0, kind: input, shape index: {}]   ;;  %s851_s1 = inlined_call_operand.hbm [shape: f32[8,32], index: 1, kind: input, shape index: {}]   ;;  %s852_s2 = inlined_call_operand.hbm [shape: f32[16,128], index: 2, kind: input, shape index: {}]   ;;  %s853_s3 = inlined_call_operand.hbm [shape: f32[32,128], index: 3, kind: input, shape index: {}]   ;;  %s854_s4 = inlined_call_operand.vmem [shape: f32[2,128], index: 4, kind: input, shape index: {}]   ;;  %s855_s5 = inlined_call_operand.hbm [shape: f32[32,128], index: 5, kind: input, shape index: {}]   ;;  %s856_s6 = inlined_call_operand.vmem [shape: f32[1,128], index: 6, kind: input, shape index: {}]   ;;  %s857_s7 = inlined_call_operand.hbm [shape: f32[8,128], index: 7, kind: output, shape index: {0}]   ;;  %s858_s8 = inlined_call_operand.hbm [shape: f32[8,32], index: 8, kind: output, shape index: {1}]  }
   0x1   :  { %15 = vsyncpa [#allocation6], 0 }
   0x2   :  { %16 = vsyncpa [#allocation9], 0 }
   0x3   :  { %17 = vsyncpa [#allocation4], 0 }
   0x4   :  { %18 = vsyncpa [#allocation13], 0  ;;  %s674_s27 = smov [#allocation5]   ;;  %s510_s9 = scalar_lea.hbm %s851_s1, 128 }
   0x5   :  { %s35_s28 = sshll.u32 %s674_s27, 4  ;;  %p511_p0 = scmp.ne.s32.totalorder %s851_s1, %s510_s9  ;;  %s36_s28 = int_to_ptr.vmem [resolvable:$true] %s35_s28 }
   0x6   :  { %p514_p1 = scmp.lt.u32.totalorder %s510_s9, %s851_s1 }
   0x8   :  { %p516_p2 = pnand %p514_p1, %p511_p0 }
   0xa   :  { %519 = shalt.err (!%p516_p2)
}
   0xb   :  { %s520_s14 = scalar_lea.vmem %s36_s28, 128  ;;  %p525_p4 = scmp.lt.s32.totalorder %s36_s28, %s36_s28 }
   0xc   :  { %p521_p3 = scmp.ne.s32.totalorder %s36_s28, %s520_s14  ;;  %p526_p5 = scmp.lt.s32.totalorder %s520_s14, %s520_s14 }
   0xe   :  { %p527_p6 = por %p526_p5, %p525_p4 }
  0x10   :  { %p528_p7 = pnand %p527_p6, %p521_p3 }
  0x12   :  { %531 = shalt.err (!%p528_p7)
}
  0x13   :  { %38 = dma.hbm_to_vmem [thread:$0]  %s851_s1, 128, %s36_s28, [#allocation6]  }
  0x14   :  { %s675_s17 = smov [#allocation8]   ;;  %s676_s19 = smov [#allocation2]  }
  0x15   :  { %s56_s18 = sshll.u32 %s675_s17, 4  ;;  %s25_s20 = sshll.u32 %s676_s19, 4  ;;  %s57_s18 = int_to_ptr.vmem [resolvable:$true] %s56_s18  ;;  %s26_s20 = int_to_ptr.vmem [resolvable:$true] %s25_s20 }
  0x16   :  { %s532_s23 = scalar_lea.hbm %s853_s3, 512 }
  0x17   :  { %p533_p8 = scmp.ne.s32.totalorder %s853_s3, %s532_s23  ;;  %p536_p9 = scmp.lt.u32.totalorder %s532_s23, %s853_s3 }
  0x19   :  { %p538_p10 = pnand %p536_p9, %p533_p8 }
  0x1b   :  { %541 = shalt.err (!%p538_p10)
}
  0x1c   :  { %s542_s1 = scalar_lea.vmem %s57_s18, 512  ;;  %p547_p12 = scmp.lt.s32.totalorder %s57_s18, %s57_s18 }
  0x1d   :  { %p543_p11 = scmp.ne.s32.totalorder %s57_s18, %s542_s1  ;;  %p548_p13 = scmp.lt.s32.totalorder %s542_s1, %s542_s1 }
  0x1f   :  { %p549_p0 = por %p548_p13, %p547_p12 }
  0x21   :  { %p550_p1 = pnand %p549_p0, %p543_p11 }
  0x23   :  { %553 = shalt.err (!%p550_p1)
}
  0x24   :  { %s677_s28 = smov 128   ;;  %s678_s29 = smov 8  }
  0x25   :  { %62 = dma.hbm_to_vmem [thread:$0]  %s853_s3, 512, %s57_s18, [#allocation9], %s677_s28, %s677_s28, %s678_s29  }
  0x26   :  { %s554_s12 = scalar_lea.hbm %s850_s0, 128 }
  0x27   :  { %p555_p2 = scmp.ne.s32.totalorder %s850_s0, %s554_s12  ;;  %p558_p3 = scmp.lt.u32.totalorder %s554_s12, %s850_s0 }
  0x29   :  { %p560_p4 = pnand %p558_p3, %p555_p2 }
  0x2b   :  { %563 = shalt.err (!%p560_p4)
}
  0x2c   :  { %s564_s17 = scalar_lea.vmem %s26_s20, 128  ;;  %p569_p6 = scmp.lt.s32.totalorder %s26_s20, %s26_s20 }
  0x2d   :  { %p565_p5 = scmp.ne.s32.totalorder %s26_s20, %s564_s17  ;;  %p570_p7 = scmp.lt.s32.totalorder %s564_s17, %s564_s17 }
  0x2f   :  { %p571_p8 = por %p570_p7, %p569_p6 }
  0x31   :  { %p572_p9 = pnand %p571_p8, %p565_p5 }
  0x33   :  { %575 = shalt.err (!%p572_p9)
}
  0x34   :  { %28 = dma.hbm_to_vmem [thread:$0]  %s850_s0, 128, %s26_s20, [#allocation3]  }
  0x35   :  { %s679_s19 = smov [#allocation7]   ;;  %s680_s22 = smov [#allocation10]  }
  0x36   :  { %s44_s21 = sshll.u32 %s679_s19, 4  ;;  %s70_s23 = sshll.u32 %s680_s22, 4  ;;  %s45_s21 = int_to_ptr.vmem [resolvable:$true] %s44_s21  ;;  %s71_s23 = int_to_ptr.vmem [resolvable:$true] %s70_s23 }
  0x37   :  { %s576_s26 = scalar_lea.hbm %s852_s2, 256 }
  0x38   :  { %p577_p10 = scmp.ne.s32.totalorder %s852_s2, %s576_s26  ;;  %p580_p11 = scmp.lt.u32.totalorder %s576_s26, %s852_s2 }
  0x3a   :  { %p582_p12 = pnand %p580_p11, %p577_p10 }
  0x3c   :  { %585 = shalt.err (!%p582_p12)
}
  0x3d   :  { %s586_s0 = scalar_lea.vmem %s45_s21, 256  ;;  %p591_p0 = scmp.lt.s32.totalorder %s45_s21, %s45_s21 }
  0x3e   :  { %p587_p13 = scmp.ne.s32.totalorder %s45_s21, %s586_s0  ;;  %p592_p1 = scmp.lt.s32.totalorder %s586_s0, %s586_s0 }
  0x40   :  { %p593_p2 = por %p592_p1, %p591_p0 }
  0x42   :  { %p594_p3 = pnand %p593_p2, %p587_p13 }
  0x44   :  { %597 = shalt.err (!%p594_p3)
}
  0x45   :  { %50 = dma.hbm_to_vmem [thread:$0]  %s852_s2, 256, %s45_s21, [#allocation6], %s677_s28, %s677_s28, %s678_s29  }
  0x46   :  { %s598_s13 = scalar_lea.hbm %s855_s5, 512 }
  0x47   :  { %p599_p4 = scmp.ne.s32.totalorder %s855_s5, %s598_s13  ;;  %p602_p5 = scmp.lt.u32.totalorder %s598_s13, %s855_s5 }
  0x49   :  { %p604_p6 = pnand %p602_p5, %p599_p4 }
  0x4b   :  { %607 = shalt.err (!%p604_p6)
}
  0x4c   :  { %s608_s3 = scalar_lea.vmem %s71_s23, 512  ;;  %p613_p8 = scmp.lt.s32.totalorder %s71_s23, %s71_s23 }
  0x4d   :  { %p609_p7 = scmp.ne.s32.totalorder %s71_s23, %s608_s3  ;;  %p614_p9 = scmp.lt.s32.totalorder %s608_s3, %s608_s3 }
  0x4f   :  { %p615_p10 = por %p614_p9, %p613_p8 }
  0x51   :  { %p616_p11 = pnand %p615_p10, %p609_p7 }
  0x53   :  { %619 = shalt.err (!%p616_p11)
}
  0x54   :  { %76 = dma.hbm_to_vmem [thread:$0]  %s855_s5, 512, %s71_s23, [#allocation9], %s677_s28, %s677_s28, %s678_s29  }
  0x55   :  { %664 = dma.done.wait [#allocation3], 128  }
  0x56   :  { %665 = vsyncadd [#allocation3], 4294967168 }
  0x57   :  { %666 = dma.done.wait [#allocation6], 384  }
  0x58   :  { %667 = vsyncadd [#allocation6], 4294966912 }
  0x59   :  { %668 = dma.done.wait [#allocation9], 1024  }
  0x5a   :  { %669 = vsyncadd [#allocation9], 4294966272  ;;  %v681_v0 = vmov 0.0|0.0   ;;  %vm682_vm0 = vmmov 0   ;;  %v683_v1 = vmov 0.0   ;;  %v177_v2 = vld [vmem:[#allocation8] sm:$0xff] }
  0x5b   :  { %474 = vmatprep.subr.bf16.mxu1 %v681_v0  ;;  %471 = vmatprep.subr.bf16.mxu0 %v681_v0  ;;  %v178_v3 = vld [vmem:[#allocation8 + $0x8] sm:$0xff]  ;;  %v96_v4 = vld [vmem:[#allocation7] sm:$0xff]  ;;  %v97_v6 = vld [vmem:[#allocation7 + $0x8] sm:$0xff]  ;;  %vm103_vm1 = vcmask 130048   ;;  %vm186_vm2 = vcmask 261120   ;;  %s684_s29 = smov 64  }
  0x5c   :  { %446 = vmatprep.mubr.msk.f32.mxu0 %vm682_vm0, %v683_v1  ;;  %457 = vmatprep.mubr.msk.f32.mxu1 %vm682_vm0, %v683_v1  ;;  %v475_v5 = vpack.c.bf16 %v178_v3, %v177_v2  ;;  %v179_v7 = vld [vmem:[#allocation8 + $0x10] sm:$0xff]  ;;  %v180_v8 = vld [vmem:[#allocation8 + $0x18] sm:$0xff]  ;;  %v472_v9 = vpack.c.bf16 %v97_v6, %v96_v4  ;;  %v94_v11 = vld [vmem:[#allocation2] sm:$0xff]  ;;  %s686_s24 = smov [#allocation12]  }
  0x5d   :  { %v478_v10 = vpack.c.bf16 %v180_v8, %v179_v7  ;;  %v95_v12 = vld [vmem:[#allocation5] sm:$0xff]  ;;  %v424_v14 = vld [vmem:[%s854_s4 + $0x1] ss:$0 sm:$0xff]  ;;  %v422_v19 = vld [vmem:[%s854_s4] ss:$0 sm:$0xff]  ;;  %s685_s4 = smov 32  }
  0x5e   :  { %476 = vmatpush3.bf16.msra.mxu1 %v475_v5  ;;  %473 = vmatpush3.bf16.msra.mxu0 %v472_v9  ;;  %v293_v33 = vld [vmem:[#allocation10] sm:$0xff]  ;;  %v294_v34 = vld [vmem:[#allocation10 + $0x8] sm:$0xff]  ;;  %v295_v35 = vld [vmem:[#allocation10 + $0x10] sm:$0xff]  ;;  %s407_s25 = sshll.u32 %s686_s24, 4  ;;  %s408_s25 = int_to_ptr.vmem [resolvable:$true] %s407_s25 }
  0x5f   :  { %477 = vmatprep.subr.bf16.mxu1 %v681_v0  ;;  %480 = vmatprep.subr.bf16.mxu0 %v681_v0  ;;  %v481_v36 = vpack.c.bf16 %v294_v34, %v293_v33  ;;  %v296_v37 = vld [vmem:[#allocation10 + $0x18] sm:$0xff]  ;;  %v427_v44 = vld [vmem:[%s856_s6] ss:$0 sm:$0xff]  ;;  %s620_s26 = scalar_lea.vmem %s408_s25, 128  ;;  %p625_p13 = scmp.lt.s32.totalorder %s408_s25, %s408_s25 }
  0x60   :  { %v484_v38 = vpack.c.bf16 %v296_v37, %v295_v35  ;;  %p621_p12 = scmp.ne.s32.totalorder %s408_s25, %s620_s26  ;;  %p626_p0 = scmp.lt.s32.totalorder %s620_s26, %s620_s26 }
  0x61   :  { %447 = vmatmul.mubr.msk.f32.vlgmr.msra.gmra.mrb[0].mxu0 %vm103_vm1, %v94_v11 }
  0x62   :  { %479 = vmatpush3.bf16.msra.mxu1 %v478_v10  ;;  %468 = vmatprep.mubr.msk.f32.mxu0 %vm682_vm0, %v683_v1  ;;  %p627_p1 = por %p626_p0, %p625_p13 }
  0x63   :  { %482 = vmatpush3.bf16.msra.mxu0 %v481_v36 }
  0x64   :  { %483 = vmatprep.subr.bf16.mxu0 %v681_v0  ;;  %p628_p2 = pnand %p627_p1, %p621_p12 }
  0x65   :  { %458 = vmatmul.mubr.msk.f32.vlgmr.msra.gmra.mrb[0].mxu1 %vm186_vm2, %v95_v12 }
  0x67   :  { %485 = vmatpush3.bf16.msra.mxu0 %v484_v38 }
 0x134   :  { %v173_v13 = vpop.f32.mrb[0].mxu0 }
 0x135   :  { %v448_v15 = vpop.f32.mrb[1].mxu0  ;;  %v174_v20 = vadd.f32 %v422_v19, %v173_v13 }
 0x138   :  { %v256_v16 = vpop.f32.mrb[0].mxu1 }
 0x139   :  { %v257_v17 = vadd.f32 %v424_v14, %v256_v16  ;;  %v459_v18 = vpop.f32.mrb[1].mxu1 }
 0x13b   :  { %268 = vrot.lane.b32.xlu0 %v257_v17, %s684_s29  ;;  %v260_v21 = vadd.f32 %v257_v17, %v174_v20 }
 0x13d   :  { %v426_v22 = vmul.f32 -1.442695, %v260_v21 }
 0x13f   :  { %500 = vpow2.f32 %v426_v22 }
 0x149   :  { %v501_v23 = vpop.eup %500 }
 0x14a   :  { %v264_v24 = vadd.f32 1.0, %v501_v23 }
 0x14c   :  { %502 = vrcp.f32 %v264_v24 }
 0x156   :  { %v503_v25 = vpop.eup %502 }
 0x1ad   :  { %v269_v26 = vpop.permute.xlu0 %268 }
 0x1ae   :  { %v271_v27 = vmul.f32 %v503_v25, %v269_v26 }
 0x1b0   :  { %273 = vrot.lane.b32.xlu0 %v271_v27, %s684_s29 }
 0x222   :  { %v274_v28 = vpop.permute.xlu0 %273 }
 0x223   :  { %v276_v29 = vadd.f32 %v274_v28, %v174_v20 }
 0x225   :  { %504 = vtanh.f32 %v276_v29 }
 0x22f   :  { %v505_v30 = vpop.eup %504 }
 0x230   :  { %279 = vrot.lane.b32.xlu1 %v505_v30, %s684_s29 }
 0x2a2   :  { %v280_v31 = vpop.permute.xlu1 %279 }
 0x2a3   :  { %v282_v32 = vsub.f32 %v95_v12, %v280_v31 }
 0x2a5   :  { %284 = vrot.lane.b32.xlu1 %v282_v32, %s685_s4 }
 0x317   :  { %v285_v39 = vpop.permute.xlu1 %284 }
 0x318   :  { %v287_v40 = vmul.f32 %v503_v25, %v285_v39 }
 0x31a   :  { %289 = vrot.lane.b32.xlu0 %v287_v40, %s685_s4 }
 0x38c   :  { %v290_v41 = vpop.permute.xlu0 %289 }
 0x38d   :  { %v292_v42 = vadd.f32 %v505_v30, %v290_v41 }
 0x38f   :  { %305 = vrot.lane.b32.xlu1 %v292_v42, %s684_s29 }
 0x401   :  { %v306_v43 = vpop.permute.xlu1 %305 }
 0x402   :  { %390 = vst.msk [vmem:[#allocation12] sm:$0xff] %vm186_vm2, %v306_v43  ;;  %469 = vmatmul.mubr.msk.f32.vlgmr.msra.gmra.mrb[2].mxu0 %vm186_vm2, %v306_v43 }
 0x4d5   :  { %v375_v45 = vpop.f32.mrb[2].mxu0 }
 0x4d6   :  { %v376_v46 = vadd.f32 %v427_v44, %v375_v45  ;;  %v470_v47 = vpop.f32.mrb[3].mxu0 }
 0x4d8   :  { %379 = vmax.xlane.f32.xlu0 %v376_v46 }
 0x565   :  { %v380_v48 = vpop.xlane.xlu0 %379 }
 0x566   :  { %v381_v49 = vsub.f32 %v376_v46, %v380_v48 }
 0x568   :  { %v382_v50 = vmul.f32 1.442695, %v381_v49 }
 0x56a   :  { %506 = vpow2.f32 %v382_v50 }
 0x574   :  { %v507_v51 = vpop.eup %506 }
 0x575   :  { %384 = vadd.xlane.f32.xlu1 %v507_v51 }
 0x576   :  { %631 = shalt.err (!%p628_p2)
}
 0x577   :  { %s632_s1 = scalar_lea.hbm %s858_s8, 128 }
 0x578   :  { %p633_p3 = scmp.ne.s32.totalorder %s858_s8, %s632_s1  ;;  %p636_p4 = scmp.lt.u32.totalorder %s632_s1, %s858_s8 }
 0x57a   :  { %p638_p5 = pnand %p636_p4, %p633_p3 }
 0x57c   :  { %641 = shalt.err (!%p638_p5)
}
 0x57d   :  { %410 = dma.vmem_to_hbm [thread:$0]  %s408_s25, 128, %s858_s8, [#allocation13]  }
 0x57e   :  { %s687_s12 = smov [#allocation11]  }
 0x57f   :  { %s397_s13 = sshll.u32 %s687_s12, 4  ;;  %s398_s13 = int_to_ptr.vmem [resolvable:$true] %s397_s13 }
 0x580   :  { %s642_s14 = scalar_lea.vmem %s398_s13, 128  ;;  %p647_p7 = scmp.lt.s32.totalorder %s398_s13, %s398_s13 }
 0x581   :  { %p643_p6 = scmp.ne.s32.totalorder %s398_s13, %s642_s14  ;;  %p648_p8 = scmp.lt.s32.totalorder %s642_s14, %s642_s14 }
 0x583   :  { %p649_p9 = por %p648_p8, %p647_p7 }
 0x585   :  { %p650_p10 = pnand %p649_p9, %p643_p6 }
 0x602   :  { %v385_v52 = vpop.xlane.xlu1 %384 }
 0x603   :  { %508 = vrcp.f32 %v385_v52 }
 0x60d   :  { %v509_v53 = vpop.eup %508 }
 0x60e   :  { %v387_v54 = vmul.f32 %v509_v53, %v507_v51 }
 0x610   :  { %388 = vst [vmem:[#allocation11] sm:$0xff] %v387_v54 }
 0x611   :  { %653 = shalt.err (!%p650_p10)
}
 0x612   :  { %s654_s17 = scalar_lea.hbm %s857_s7, 128 }
 0x613   :  { %p655_p11 = scmp.ne.s32.totalorder %s857_s7, %s654_s17  ;;  %p658_p12 = scmp.lt.u32.totalorder %s654_s17, %s857_s7 }
 0x615   :  { %p660_p13 = pnand %p658_p12, %p655_p11 }
 0x617   :  { %663 = shalt.err (!%p660_p13)
}
 0x618   :  { %400 = dma.vmem_to_hbm [thread:$0]  %s398_s13, 128, %s857_s7, [#allocation4]  }
 0x619   :  { %670 = dma.done.wait [#allocation4], 128  }
 0x61a   :  { %671 = vsyncadd [#allocation4], 4294967168 }
 0x61b   :  { %672 = dma.done.wait [#allocation13], 128  }
 0x61c   :  { %673 = vsyncadd [#allocation13], 4294967168 }
 0x61d   :  { %417 = vsyncpa [#allocation3], 1 }
 0x61e   :  { %418 = vsyncpa [#allocation6], 1 }
 0x61f   :  { %419 = vsyncpa [#allocation9], 1 }
 0x620   :  { %420 = vsyncpa [#allocation4], 1 }
 0x621   :  { %421 = vsyncpa [#allocation13], 1 }

</bundles_post_ra>
